<compile_context>
chip_gen: v6e
topology: v6e:2x2x1
jax: 0.10.0
libtpu: 0.0.40
codegen_flags: <defaults>
</compile_context>

<pallas_src>
import jax
import jax.numpy as jnp
from jax.experimental import pallas as pl
from jax.experimental.pallas import tpu as pltpu

LANES = 128          # lane width: every feature dim (4/20/40/20/2) pads to one vreg row
NUM_LAYERS = 4
IN_DIM, OUT_DIM = 4, 2
LAYER_DIMS = [(4, 20), (20, 40), (40, 20), (20, 2)]


def mlp_kernel(x_ref, w_ref, b_ref, o_ref):
    # x_ref: (TILE_B, 128) f32  -- batch tile, features lane-padded with zeros
    # w_ref: (4, 128, 128) f32  -- packed, zero-padded weights (VMEM-resident)
    # b_ref: (8, 128) f32       -- packed, zero-padded biases (rows 0..3 used)
    # o_ref: (TILE_B, 128) f32  -- lane-dense output block; cols 2..127 are zero
    x = x_ref[...]

    h = jnp.dot(x, w_ref[0], preferred_element_type=jnp.float32) + b_ref[pl.ds(0, 1), :]
    h = jnp.maximum(h, 0.0)

    h = jnp.dot(h, w_ref[1], preferred_element_type=jnp.float32) + b_ref[pl.ds(1, 1), :]
    h = jnp.maximum(h, 0.0)

    h = jnp.dot(h, w_ref[2], preferred_element_type=jnp.float32) + b_ref[pl.ds(2, 1), :]
    h = jnp.maximum(h, 0.0)

    out = jnp.dot(h, w_ref[3], preferred_element_type=jnp.float32) + b_ref[pl.ds(3, 1), :]
    o_ref[...] = out.astype(o_ref.dtype)


def _round_up(n, m):
    return ((n + m - 1) // m) * m


def pack_params(params):
    """Pack the 4 (w, b) pairs into one weight slab and one bias slab."""
    w_packed = jnp.zeros((NUM_LAYERS, LANES, LANES), jnp.float32)
    b_packed = jnp.zeros((8, LANES), jnp.float32)  # 8 rows = one (8,128) f32 tile
    for i, (w, b) in enumerate(params):
        fin, fout = w.shape
        w_packed = w_packed.at[i, :fin, :fout].set(w)
        b_packed = b_packed.at[i, :fout].set(b.reshape(-1))
    return w_packed, b_packed


def mlp_forward(x, w_packed, b_packed, *, tile_b=512):
    B, F = x.shape
    assert F == IN_DIM

    # Tile size: multiple of 8 (f32 sublanes); shrink to the batch if B is tiny.
    tile_b = min(tile_b, _round_up(B, 8))
    b_pad = pl.cdiv(B, tile_b) * tile_b

    # Pad batch to a multiple of tile_b and features to a full 128-lane row.
    # Zero padding is exact (padded weight rows/cols are zero too).
    x_pad = jnp.pad(x, ((0, b_pad - B), (0, LANES - F)))

    grid = (b_pad // tile_b,)

    out = pl.pallas_call(
        mlp_kernel,
        out_shape=jax.ShapeDtypeStruct((b_pad, LANES), jnp.float32),
        grid_spec=pltpu.PrefetchScalarGridSpec(
            num_scalar_prefetch=0,
            grid=grid,
            in_specs=[
                # x: one batch tile per grid step (double-buffered by Pallas)
                pl.BlockSpec((tile_b, LANES), lambda i: (i, 0)),
                # packed weights: constant index_map -> VMEM-resident across steps
                pl.BlockSpec((NUM_LAYERS, LANES, LANES), lambda i: (0, 0, 0)),
                # packed biases: constant index_map -> VMEM-resident
                pl.BlockSpec((8, LANES), lambda i: (0, 0)),
            ],
            out_specs=pl.BlockSpec((tile_b, LANES), lambda i: (i, 0)),
        ),
        compiler_params=pltpu.CompilerParams(
            dimension_semantics=("parallel",),  # megacore sharding on v7x
        ),
    )(x_pad, w_packed, b_packed)

    # Slice away batch padding and the zero lanes beyond the 2 real outputs.
    return out[:B, :OUT_DIM]


def init_linear(key, fan_in, fan_out):
    # Mimics PyTorch's default uniform(-1/sqrt(fan_in), 1/sqrt(fan_in)) init.
    kw, kb = jax.random.split(key)
    bound = 1.0 / (fan_in ** 0.5)
    # Stored as [in, out] so forward is x @ W + b (== torch's x @ W.T + b).
    w = jax.random.uniform(kw, (fan_in, fan_out), jnp.float32, -bound, bound)
    b = jax.random.uniform(kb, (1, fan_out), jnp.float32, -bound, bound)
    return w, b


def make_params(key):
    keys = jax.random.split(key, NUM_LAYERS)
    return tuple(init_linear(k, fi, fo) for k, (fi, fo) in zip(keys, LAYER_DIMS))


def reference_forward(x, params):
    (w1, b1), (w2, b2), (w3, b3), (w4, b4) = params
    h = jnp.maximum(x @ w1 + b1, 0.0)
    h = jnp.maximum(h @ w2 + b2, 0.0)
    h = jnp.maximum(h @ w3 + b3, 0.0)
    return h @ w4 + b4


if __name__ == "__main__":
    key = jax.random.PRNGKey(0)
    k_params, k_x = jax.random.split(key)

    params = make_params(k_params)
    w_packed, b_packed = pack_params(params)

    x = jax.random.normal(k_x, (8, IN_DIM), jnp.float32)  # batch=8, in_features=4

    out = mlp_forward(x, w_packed, b_packed)
    out = jax.block_until_ready(out)

    ref = reference_forward(x, params)
    assert out.shape == (8, OUT_DIM)
    assert jnp.allclose(out, ref, atol=1e-5, rtol=1e-5)

    print("KERNEL_OK")
</pallas_src>

<mosaic_0001>
module attributes {stable_mosaic.version = 11 : i64} {
  func.func @mlp_kernel(%arg0: i32, %arg1: memref<8x128xf32, #tpu.memory_space<vmem>>, %arg2: memref<4x128x128xf32, #tpu.memory_space<vmem>>, %arg3: memref<8x128xf32, #tpu.memory_space<vmem>>, %arg4: memref<8x128xf32, #tpu.memory_space<vmem>>) attributes {dimension_semantics = [#tpu.dimension_semantics<parallel>], iteration_bounds = array<i64: 1>, scalar_prefetch = 0 : i64, scratch_operands = 0 : i64, tpu.core_type = #tpu.core_type<tc>, window_params = [{transform_indices = @transform_0, window_bounds = array<i64: 8, 128>}, {pipeline_mode = #tpu.pipeline_mode<synchronous>, transform_indices = @transform_1, window_bounds = array<i64: 4, 128, 128>}, {pipeline_mode = #tpu.pipeline_mode<synchronous>, transform_indices = @transform_2, window_bounds = array<i64: 8, 128>}, {transform_indices = @transform_3, window_bounds = array<i64: 8, 128>}]} {
    %c0 = arith.constant 0 : index
    %c0_0 = arith.constant 0 : index
    %0 = vector.load %arg1[%c0, %c0_0] : memref<8x128xf32, #tpu.memory_space<vmem>>, vector<8x128xf32>
    %c0_1 = arith.constant 0 : index
    %c0_2 = arith.constant 0 : index
    %c0_3 = arith.constant 0 : index
    %1 = vector.load %arg2[%c0_1, %c0_2, %c0_3] : memref<4x128x128xf32, #tpu.memory_space<vmem>>, vector<1x128x128xf32>
    %2 = vector.shape_cast %1 : vector<1x128x128xf32> to vector<128x128xf32>
    %cst = arith.constant dense<0.000000e+00> : vector<8x128xf32>
    %3 = tpu.matmul %0, %2, %cst {dimension_numbers = #tpu.dot_dimension_numbers<[1], [0], [0], [1], [0, 0, 1, 1], [], []>} : vector<8x128xf32>, vector<128x128xf32>, vector<8x128xf32> -> vector<8x128xf32>
    %c0_4 = arith.constant 0 : index
    %c0_5 = arith.constant 0 : index
    %4 = vector.load %arg3[%c0_4, %c0_5] : memref<8x128xf32, #tpu.memory_space<vmem>>, vector<1x128xf32>
    %5 = vector.broadcast %4 : vector<1x128xf32> to vector<8x128xf32>
    %6 = arith.addf %3, %5 : vector<8x128xf32>
    %cst_6 = arith.constant 0.000000e+00 : f32
    %7 = vector.broadcast %cst_6 : f32 to vector<8x128xf32>
    %8 = arith.maximumf %6, %7 : vector<8x128xf32>
    %c1 = arith.constant 1 : index
    %c0_7 = arith.constant 0 : index
    %c0_8 = arith.constant 0 : index
    %9 = vector.load %arg2[%c1, %c0_7, %c0_8] : memref<4x128x128xf32, #tpu.memory_space<vmem>>, vector<1x128x128xf32>
    %10 = vector.shape_cast %9 : vector<1x128x128xf32> to vector<128x128xf32>
    %cst_9 = arith.constant dense<0.000000e+00> : vector<8x128xf32>
    %11 = tpu.matmul %8, %10, %cst_9 {dimension_numbers = #tpu.dot_dimension_numbers<[1], [0], [0], [1], [0, 0, 1, 1], [], []>} : vector<8x128xf32>, vector<128x128xf32>, vector<8x128xf32> -> vector<8x128xf32>
    %c1_10 = arith.constant 1 : index
    %c0_11 = arith.constant 0 : index
    %12 = vector.load %arg3[%c1_10, %c0_11] : memref<8x128xf32, #tpu.memory_space<vmem>>, vector<1x128xf32>
    %13 = vector.broadcast %12 : vector<1x128xf32> to vector<8x128xf32>
    %14 = arith.addf %11, %13 : vector<8x128xf32>
    %cst_12 = arith.constant 0.000000e+00 : f32
    %15 = vector.broadcast %cst_12 : f32 to vector<8x128xf32>
    %16 = arith.maximumf %14, %15 : vector<8x128xf32>
    %c2 = arith.constant 2 : index
    %c0_13 = arith.constant 0 : index
    %c0_14 = arith.constant 0 : index
    %17 = vector.load %arg2[%c2, %c0_13, %c0_14] : memref<4x128x128xf32, #tpu.memory_space<vmem>>, vector<1x128x128xf32>
    %18 = vector.shape_cast %17 : vector<1x128x128xf32> to vector<128x128xf32>
    %cst_15 = arith.constant dense<0.000000e+00> : vector<8x128xf32>
    %19 = tpu.matmul %16, %18, %cst_15 {dimension_numbers = #tpu.dot_dimension_numbers<[1], [0], [0], [1], [0, 0, 1, 1], [], []>} : vector<8x128xf32>, vector<128x128xf32>, vector<8x128xf32> -> vector<8x128xf32>
    %c2_16 = arith.constant 2 : index
    %c0_17 = arith.constant 0 : index
    %20 = vector.load %arg3[%c2_16, %c0_17] : memref<8x128xf32, #tpu.memory_space<vmem>>, vector<1x128xf32>
    %21 = vector.broadcast %20 : vector<1x128xf32> to vector<8x128xf32>
    %22 = arith.addf %19, %21 : vector<8x128xf32>
    %cst_18 = arith.constant 0.000000e+00 : f32
    %23 = vector.broadcast %cst_18 : f32 to vector<8x128xf32>
    %24 = arith.maximumf %22, %23 : vector<8x128xf32>
    %c3 = arith.constant 3 : index
    %c0_19 = arith.constant 0 : index
    %c0_20 = arith.constant 0 : index
    %25 = vector.load %arg2[%c3, %c0_19, %c0_20] : memref<4x128x128xf32, #tpu.memory_space<vmem>>, vector<1x128x128xf32>
    %26 = vector.shape_cast %25 : vector<1x128x128xf32> to vector<128x128xf32>
    %cst_21 = arith.constant dense<0.000000e+00> : vector<8x128xf32>
    %27 = tpu.matmul %24, %26, %cst_21 {dimension_numbers = #tpu.dot_dimension_numbers<[1], [0], [0], [1], [0, 0, 1, 1], [], []>} : vector<8x128xf32>, vector<128x128xf32>, vector<8x128xf32> -> vector<8x128xf32>
    %c3_22 = arith.constant 3 : index
    %c0_23 = arith.constant 0 : index
    %28 = vector.load %arg3[%c3_22, %c0_23] : memref<8x128xf32, #tpu.memory_space<vmem>>, vector<1x128xf32>
    %29 = vector.broadcast %28 : vector<1x128xf32> to vector<8x128xf32>
    %30 = arith.addf %27, %29 : vector<8x128xf32>
    %c0_24 = arith.constant 0 : index
    %c0_25 = arith.constant 0 : index
    %31 = vector.load %arg4[%c0_24, %c0_25] : memref<8x128xf32, #tpu.memory_space<vmem>>, vector<8x128xf32>
    tpu.vector_store %arg4[%c0_24, %c0_25], %30 {strides = array<i32>} : memref<8x128xf32, #tpu.memory_space<vmem>>, vector<8x128xf32>,
    return
  }
  func.func @transform_0(%arg0: i32) -> (i32, i32) {
    %c0_i32 = arith.constant 0 : i32
    %c0_i32_0 = arith.constant 0 : i32
    return %arg0, %c0_i32 : i32, i32
  }
  func.func @transform_1(%arg0: i32) -> (i32, i32, i32) {
    %c0_i32 = arith.constant 0 : i32
    %c0_i32_0 = arith.constant 0 : i32
    %c0_i32_1 = arith.constant 0 : i32
    %c0_i32_2 = arith.constant 0 : i32
    return %c0_i32, %c0_i32_0, %c0_i32_1 : i32, i32, i32
  }
  func.func @transform_2(%arg0: i32) -> (i32, i32) {
    %c0_i32 = arith.constant 0 : i32
    %c0_i32_0 = arith.constant 0 : i32
    %c0_i32_1 = arith.constant 0 : i32
    return %c0_i32, %c0_i32_0 : i32, i32
  }
  func.func @transform_3(%arg0: i32) -> (i32, i32) {
    %c0_i32 = arith.constant 0 : i32
    %c0_i32_0 = arith.constant 0 : i32
    return %arg0, %c0_i32 : i32, i32
  }
}

</mosaic_0001>

<bundles_post_ra>
// kernel: tpu_custom_call.1
= control target key start
LH: loop header
LB: loop body
LE: loop exit
PB: predicated region body
PF: predicated region fallthrough
CT: control target
= control target key end

     0   :  { %8 = vsyncpa [#allocation3], 0  ;;  %s858_s0 = inlined_call_operand.hbm [shape: f32[8,128], index: 0, kind: input, shape index: {}]   ;;  %s859_s1 = inlined_call_operand.hbm [shape: f32[4,128,128], index: 1, kind: input, shape index: {}]   ;;  %s860_s2 = inlined_call_operand.hbm [shape: f32[8,128], index: 2, kind: input, shape index: {}]   ;;  %s861_s3 = inlined_call_operand.hbm [shape: f32[8,128], index: 3, kind: output, shape index: {}]  }
   0x1   :  { %9 = vsyncpa [#allocation6], 0 }
   0x2   :  { %10 = vsyncpa [#allocation4], 0  ;;  %s746_s12 = smov [#allocation5]  }
   0x3   :  { %s26_s13 = sshll.u32 %s746_s12, 4  ;;  %s27_s13 = int_to_ptr.vmem [resolvable:$true] %s26_s13 }
   0x4   :  { %s668_s14 = scalar_lea.vmem %s27_s13, 8192  ;;  %p673_p1 = scmp.lt.s32.totalorder %s27_s13, %s27_s13 }
   0x5   :  { %p669_p0 = scmp.ne.s32.totalorder %s27_s13, %s668_s14  ;;  %p674_p2 = scmp.lt.s32.totalorder %s668_s14, %s668_s14 }
   0x7   :  { %p675_p3 = por %p674_p2, %p673_p1 }
   0x9   :  { %p676_p4 = pnand %p675_p3, %p669_p0 }
   0xb   :  { %679 = shalt.err (!%p676_p4)
}
   0xc   :  { %s747_s15 = smov 128   ;;  %s748_s16 = smov 8  }
   0xd   :  { %32 = dma.hbm_to_vmem [thread:$0]  %s859_s1, 8192, %s27_s13, [#allocation6], %s747_s15, %s747_s15, %s748_s16  }
   0xe   :  { %s749_s19 = smov [#allocation2]   ;;  %s750_s21 = smov [#allocation7]  }
   0xf   :  { %s17_s20 = sshll.u32 %s749_s19, 4  ;;  %s39_s22 = sshll.u32 %s750_s21, 4  ;;  %s18_s20 = int_to_ptr.vmem [resolvable:$true] %s17_s20  ;;  %s40_s22 = int_to_ptr.vmem [resolvable:$true] %s39_s22 }
  0x10   :  { %s688_s23 = scalar_lea.vmem %s18_s20, 128  ;;  %p693_p6 = scmp.lt.s32.totalorder %s18_s20, %s18_s20 }
  0x11   :  { %p689_p5 = scmp.ne.s32.totalorder %s18_s20, %s688_s23  ;;  %p694_p7 = scmp.lt.s32.totalorder %s688_s23, %s688_s23 }
  0x13   :  { %p695_p8 = por %p694_p7, %p693_p6 }
  0x15   :  { %p696_p9 = pnand %p695_p8, %p689_p5 }
  0x17   :  { %699 = shalt.err (!%p696_p9)
}
  0x18   :  { %20 = dma.hbm_to_vmem [thread:$0]  %s858_s0, 128, %s18_s20, [#allocation3]  }
  0x19   :  { %s708_s26 = scalar_lea.vmem %s40_s22, 128  ;;  %p713_p11 = scmp.lt.s32.totalorder %s40_s22, %s40_s22 }
  0x1a   :  { %p709_p10 = scmp.ne.s32.totalorder %s40_s22, %s708_s26  ;;  %p714_p12 = scmp.lt.s32.totalorder %s708_s26, %s708_s26 }
  0x1c   :  { %p715_p13 = por %p714_p12, %p713_p11 }
  0x1e   :  { %p716_p0 = pnand %p715_p13, %p709_p10 }
  0x20   :  { %719 = shalt.err (!%p716_p0)
}
  0x21   :  { %42 = dma.hbm_to_vmem [thread:$0]  %s860_s2, 128, %s40_s22, [#allocation6]  }
  0x22   :  { %740 = dma.done.wait [#allocation3], 128  }
  0x23   :  { %741 = vsyncadd [#allocation3], 4294967168 }
  0x24   :  { %742 = dma.done.wait [#allocation6], 8320  }
  0x25   :  { %743 = vsyncadd [#allocation6], 4294958976  ;;  %v751_v0 = vmov 0.0   ;;  %vm752_vm0 = vmmov 0   ;;  %v68_v1 = vld [vmem:[#allocation5 + $0x78] sm:$0xff]  ;;  %v67_v2 = vld [vmem:[#allocation5 + $0x70] sm:$0xff] }
  0x26   :  { %512 = vmatprep.subr.mxu0 %v751_v0  ;;  %544 = vmatprep.mubr.msk.f32.mxu0 %vm752_vm0, %v751_v0  ;;  %v66_v3 = vld [vmem:[#allocation5 + $0x68] sm:$0xff]  ;;  %v65_v4 = vld [vmem:[#allocation5 + $0x60] sm:$0xff]  ;;  %v161_v5 = vld [vmem:[#allocation5 + $0xf8] sm:$0xff]  ;;  %s753_s0 = smov [#allocation8]  }
  0x27   :  { %547 = vmatprep.subr.mxu1 %v751_v0  ;;  %579 = vmatprep.mubr.msk.f32.mxu1 %vm752_vm0, %v751_v0  ;;  %v64_v6 = vld [vmem:[#allocation5 + $0x58] sm:$0xff]  ;;  %v160_v7 = vld [vmem:[#allocation5 + $0xf0] sm:$0xff]  ;;  %v159_v8 = vld [vmem:[#allocation5 + $0xe8] sm:$0xff]  ;;  %s430_s2 = sshll.u32 %s753_s0, 4  ;;  %s431_s2 = int_to_ptr.vmem [resolvable:$true] %s430_s2 }
  0x28   :  { %513 = vmatpush3.msra.mxu0 %v68_v1  ;;  %548 = vmatpush3.msra.mxu1 %v161_v5  ;;  %v63_v9 = vld [vmem:[#allocation5 + $0x50] sm:$0xff]  ;;  %v158_v10 = vld [vmem:[#allocation5 + $0xe0] sm:$0xff]  ;;  %v62_v11 = vld [vmem:[#allocation5 + $0x48] sm:$0xff]  ;;  %s720_s28 = scalar_lea.vmem %s431_s2, 128  ;;  %p725_p2 = scmp.lt.s32.totalorder %s431_s2, %s431_s2 }
  0x29   :  { %514 = vmatprep.subr.mxu0 %v751_v0  ;;  %549 = vmatprep.subr.mxu1 %v751_v0  ;;  %v157_v12 = vld [vmem:[#allocation5 + $0xd8] sm:$0xff]  ;;  %v61_v13 = vld [vmem:[#allocation5 + $0x40] sm:$0xff]  ;;  %v156_v14 = vld [vmem:[#allocation5 + $0xd0] sm:$0xff]  ;;  %p721_p1 = scmp.ne.s32.totalorder %s431_s2, %s720_s28  ;;  %p726_p3 = scmp.lt.s32.totalorder %s720_s28, %s720_s28 }
  0x2a   :  { %515 = vmatpush3.msra.mxu0 %v67_v2  ;;  %550 = vmatpush3.msra.mxu1 %v160_v7  ;;  %v60_v15 = vld [vmem:[#allocation5 + $0x38] sm:$0xff]  ;;  %v155_v16 = vld [vmem:[#allocation5 + $0xc8] sm:$0xff]  ;;  %v59_v17 = vld [vmem:[#allocation5 + $0x30] sm:$0xff] }
  0x2b   :  { %516 = vmatprep.subr.mxu0 %v751_v0  ;;  %551 = vmatprep.subr.mxu1 %v751_v0  ;;  %v154_v18 = vld [vmem:[#allocation5 + $0xc0] sm:$0xff]  ;;  %v58_v19 = vld [vmem:[#allocation5 + $0x28] sm:$0xff]  ;;  %v153_v20 = vld [vmem:[#allocation5 + $0xb8] sm:$0xff]  ;;  %p727_p4 = por %p726_p3, %p725_p2 }
  0x2c   :  { %517 = vmatpush3.msra.mxu0 %v66_v3  ;;  %552 = vmatpush3.msra.mxu1 %v159_v8  ;;  %v57_v21 = vld [vmem:[#allocation5 + $0x20] sm:$0xff]  ;;  %v152_v22 = vld [vmem:[#allocation5 + $0xb0] sm:$0xff]  ;;  %v56_v23 = vld [vmem:[#allocation5 + $0x18] sm:$0xff] }
  0x2d   :  { %518 = vmatprep.subr.mxu0 %v751_v0  ;;  %553 = vmatprep.subr.mxu1 %v751_v0  ;;  %v151_v24 = vld [vmem:[#allocation5 + $0xa8] sm:$0xff]  ;;  %v55_v25 = vld [vmem:[#allocation5 + $0x10] sm:$0xff]  ;;  %v150_v26 = vld [vmem:[#allocation5 + $0xa0] sm:$0xff]  ;;  %p728_p5 = pnand %p727_p4, %p721_p1 }
  0x2e   :  { %519 = vmatpush3.msra.mxu0 %v65_v4  ;;  %554 = vmatpush3.msra.mxu1 %v158_v10  ;;  %v54_v27 = vld [vmem:[#allocation5 + $0x8] sm:$0xff]  ;;  %v149_v28 = vld [vmem:[#allocation5 + $0x98] sm:$0xff]  ;;  %v53_v29 = vld [vmem:[#allocation5] sm:$0xff] }
  0x2f   :  { %520 = vmatprep.subr.mxu0 %v751_v0  ;;  %555 = vmatprep.subr.mxu1 %v751_v0  ;;  %v52_v30 = vld [vmem:[#allocation2] sm:$0xff]  ;;  %v148_v31 = vld [vmem:[#allocation5 + $0x90] sm:$0xff]  ;;  %v147_v32 = vld [vmem:[#allocation5 + $0x88] sm:$0xff] }
  0x30   :  { %521 = vmatpush3.msra.mxu0 %v64_v6  ;;  %556 = vmatpush3.msra.mxu1 %v157_v12  ;;  %v146_v33 = vld [vmem:[#allocation5 + $0x80] sm:$0xff]  ;;  %v254_v34 = vld [vmem:[#allocation5 + $0x178] sm:$0xff]  ;;  %v253_v35 = vld [vmem:[#allocation5 + $0x170] sm:$0xff] }
  0x31   :  { %522 = vmatprep.subr.mxu0 %v751_v0  ;;  %557 = vmatprep.subr.mxu1 %v751_v0  ;;  %v252_v36 = vld [vmem:[#allocation5 + $0x168] sm:$0xff]  ;;  %v251_v37 = vld [vmem:[#allocation5 + $0x160] sm:$0xff]  ;;  %v250_v38 = vld [vmem:[#allocation5 + $0x158] sm:$0xff] }
  0x32   :  { %523 = vmatpush3.msra.mxu0 %v63_v9  ;;  %558 = vmatpush3.msra.mxu1 %v156_v14  ;;  %v249_v39 = vld [vmem:[#allocation5 + $0x150] sm:$0xff]  ;;  %v248_v40 = vld [vmem:[#allocation5 + $0x148] sm:$0xff]  ;;  %v247_v41 = vld [vmem:[#allocation5 + $0x140] sm:$0xff] }
  0x33   :  { %524 = vmatprep.subr.mxu0 %v751_v0  ;;  %559 = vmatprep.subr.mxu1 %v751_v0  ;;  %v246_v42 = vld [vmem:[#allocation5 + $0x138] sm:$0xff]  ;;  %v245_v43 = vld [vmem:[#allocation5 + $0x130] sm:$0xff]  ;;  %v244_v44 = vld [vmem:[#allocation5 + $0x128] sm:$0xff] }
  0x34   :  { %525 = vmatpush3.msra.mxu0 %v62_v11  ;;  %560 = vmatpush3.msra.mxu1 %v155_v16  ;;  %v243_v45 = vld [vmem:[#allocation5 + $0x120] sm:$0xff]  ;;  %v242_v46 = vld [vmem:[#allocation5 + $0x118] sm:$0xff]  ;;  %v241_v52 = vld [vmem:[#allocation5 + $0x110] sm:$0xff] }
  0x35   :  { %526 = vmatprep.subr.mxu0 %v751_v0  ;;  %561 = vmatprep.subr.mxu1 %v751_v0  ;;  %v440_v47 = vld [vmem:[#allocation7] ss:$0 sm:$0xff]  ;;  %v240_v53 = vld [vmem:[#allocation5 + $0x108] sm:$0xff]  ;;  %v347_v55 = vld [vmem:[#allocation5 + $0x1f8] sm:$0xff] }
  0x36   :  { %527 = vmatpush3.msra.mxu0 %v61_v13  ;;  %562 = vmatpush3.msra.mxu1 %v154_v18  ;;  %v239_v54 = vld [vmem:[#allocation5 + $0x100] sm:$0xff]  ;;  %v346_v56 = vld [vmem:[#allocation5 + $0x1f0] sm:$0xff]  ;;  %v345_v57 = vld [vmem:[#allocation5 + $0x1e8] sm:$0xff] }
  0x37   :  { %528 = vmatprep.subr.mxu0 %v751_v0  ;;  %563 = vmatprep.subr.mxu1 %v751_v0  ;;  %v344_v58 = vld [vmem:[#allocation5 + $0x1e0] sm:$0xff]  ;;  %v343_v59 = vld [vmem:[#allocation5 + $0x1d8] sm:$0xff]  ;;  %v342_v60 = vld [vmem:[#allocation5 + $0x1d0] sm:$0xff] }
  0x38   :  { %529 = vmatpush3.msra.mxu0 %v60_v15  ;;  %564 = vmatpush3.msra.mxu1 %v153_v20  ;;  %v341_v61 = vld [vmem:[#allocation5 + $0x1c8] sm:$0xff]  ;;  %v340_v62 = vld [vmem:[#allocation5 + $0x1c0] sm:$0xff]  ;;  %v339_v63 = vld [vmem:[#allocation5 + $0x1b8] sm:$0xff] }
  0x39   :  { %530 = vmatprep.subr.mxu0 %v751_v0  ;;  %565 = vmatprep.subr.mxu1 %v751_v0  ;;  %v338_v1 = vld [vmem:[#allocation5 + $0x1b0] sm:$0xff]  ;;  %v337_v2 = vld [vmem:[#allocation5 + $0x1a8] sm:$0xff]  ;;  %v336_v3 = vld [vmem:[#allocation5 + $0x1a0] sm:$0xff] }
  0x3a   :  { %531 = vmatpush3.msra.mxu0 %v59_v17  ;;  %566 = vmatpush3.msra.mxu1 %v152_v22  ;;  %v335_v4 = vld [vmem:[#allocation5 + $0x198] sm:$0xff]  ;;  %v441_v5 = vld [vmem:[#allocation7 + $0x1] ss:$0 sm:$0xff]  ;;  %v334_v10 = vld [vmem:[#allocation5 + $0x190] sm:$0xff] }
  0x3b   :  { %532 = vmatprep.subr.mxu0 %v751_v0  ;;  %567 = vmatprep.subr.mxu1 %v751_v0  ;;  %v333_v11 = vld [vmem:[#allocation5 + $0x188] sm:$0xff]  ;;  %v332_v12 = vld [vmem:[#allocation5 + $0x180] sm:$0xff] }
  0x3c   :  { %533 = vmatpush3.msra.mxu0 %v58_v19  ;;  %568 = vmatpush3.msra.mxu1 %v151_v24  ;;  %v442_v13 = vld [vmem:[#allocation7 + $0x2] ss:$0 sm:$0xff]  ;;  %v443_v18 = vld [vmem:[#allocation7 + $0x3] ss:$0 sm:$0xff] }
  0x3d   :  { %534 = vmatprep.subr.mxu0 %v751_v0  ;;  %569 = vmatprep.subr.mxu1 %v751_v0 }
  0x3e   :  { %535 = vmatpush3.msra.mxu0 %v57_v21  ;;  %570 = vmatpush3.msra.mxu1 %v150_v26 }
  0x3f   :  { %536 = vmatprep.subr.mxu0 %v751_v0  ;;  %571 = vmatprep.subr.mxu1 %v751_v0 }
  0x40   :  { %537 = vmatpush3.msra.mxu0 %v56_v23  ;;  %572 = vmatpush3.msra.mxu1 %v149_v28 }
  0x41   :  { %538 = vmatprep.subr.mxu0 %v751_v0  ;;  %573 = vmatprep.subr.mxu1 %v751_v0 }
  0x42   :  { %539 = vmatpush3.msra.mxu0 %v55_v25  ;;  %574 = vmatpush3.msra.mxu1 %v148_v31 }
  0x43   :  { %540 = vmatprep.subr.mxu0 %v751_v0  ;;  %575 = vmatprep.subr.mxu1 %v751_v0 }
  0x44   :  { %541 = vmatpush3.msra.mxu0 %v54_v27  ;;  %576 = vmatpush3.msra.mxu1 %v147_v32 }
  0x45   :  { %542 = vmatprep.subr.mxu0 %v751_v0  ;;  %577 = vmatprep.subr.mxu1 %v751_v0 }
  0x46   :  { %543 = vmatpush3.msra.mxu0 %v53_v29  ;;  %578 = vmatpush3.msra.mxu1 %v146_v33 }
  0x47   :  { %545 = vmatmul.mubr.f32.vlgmr.msra.gmra.mxu0 %v52_v30  ;;  %582 = vmatprep.subr.mxu0 %v751_v0 }
  0x48   :  { %614 = vmatprep.mubr.msk.f32.mxu0 %vm752_vm0, %v751_v0  ;;  %617 = vmatprep.subr.mxu1 %v751_v0 }
  0x49   :  { %583 = vmatpush3.msra.mxu0 %v254_v34 }
  0x4a   :  { %584 = vmatprep.subr.mxu0 %v751_v0 }
  0x4b   :  { %585 = vmatpush3.msra.mxu0 %v253_v35 }
  0x4c   :  { %586 = vmatprep.subr.mxu0 %v751_v0 }
  0x4d   :  { %587 = vmatpush3.msra.mxu0 %v252_v36 }
  0x4e   :  { %588 = vmatprep.subr.mxu0 %v751_v0 }
  0x4f   :  { %589 = vmatpush3.msra.mxu0 %v251_v37 }
  0x50   :  { %590 = vmatprep.subr.mxu0 %v751_v0 }
  0x51   :  { %591 = vmatpush3.msra.mxu0 %v250_v38 }
  0x52   :  { %592 = vmatprep.subr.mxu0 %v751_v0 }
  0x53   :  { %593 = vmatpush3.msra.mxu0 %v249_v39 }
  0x54   :  { %594 = vmatprep.subr.mxu0 %v751_v0 }
  0x55   :  { %595 = vmatpush3.msra.mxu0 %v248_v40 }
  0x56   :  { %596 = vmatprep.subr.mxu0 %v751_v0 }
  0x57   :  { %597 = vmatpush3.msra.mxu0 %v247_v41 }
  0x58   :  { %598 = vmatprep.subr.mxu0 %v751_v0 }
  0x59   :  { %599 = vmatpush3.msra.mxu0 %v246_v42 }
  0x5a   :  { %600 = vmatprep.subr.mxu0 %v751_v0 }
  0x5b   :  { %601 = vmatpush3.msra.mxu0 %v245_v43 }
  0x5c   :  { %602 = vmatprep.subr.mxu0 %v751_v0 }
  0x5d   :  { %603 = vmatpush3.msra.mxu0 %v244_v44 }
  0x5e   :  { %604 = vmatprep.subr.mxu0 %v751_v0 }
  0x5f   :  { %605 = vmatpush3.msra.mxu0 %v243_v45 }
  0x60   :  { %606 = vmatprep.subr.mxu0 %v751_v0 }
  0x61   :  { %607 = vmatpush3.msra.mxu0 %v242_v46 }
  0x62   :  { %608 = vmatprep.subr.mxu0 %v751_v0 }
  0x63   :  { %609 = vmatpush3.msra.mxu0 %v241_v52 }
  0x64   :  { %610 = vmatprep.subr.mxu0 %v751_v0 }
  0x65   :  { %611 = vmatpush3.msra.mxu0 %v240_v53 }
  0x66   :  { %612 = vmatprep.subr.mxu0 %v751_v0 }
  0x67   :  { %613 = vmatpush3.msra.mxu0 %v239_v54 }
 0x107   :  { %v140_v48 = vpop.f32.mrf.mxu0 }
 0x108   :  { %v141_v49 = vadd.f32 %v440_v47, %v140_v48 }
 0x109   :  { %v546_v50 = vpop.f32.mrf.mxu0 }
 0x10a   :  { %v144_v51 = vmax.f32 %v141_v49, 0.0 }
 0x10c   :  { %580 = vmatmul.mubr.f32.vlgmr.msra.gmra.mxu1 %v144_v51 }
 0x10d   :  { %649 = vmatprep.mubr.msk.f32.mxu1 %vm752_vm0, %v751_v0  ;;  %618 = vmatpush3.msra.mxu1 %v347_v55 }
 0x10e   :  { %619 = vmatprep.subr.mxu1 %v751_v0 }
 0x10f   :  { %620 = vmatpush3.msra.mxu1 %v346_v56 }
 0x110   :  { %621 = vmatprep.subr.mxu1 %v751_v0 }
 0x111   :  { %622 = vmatpush3.msra.mxu1 %v345_v57 }
 0x112   :  { %623 = vmatprep.subr.mxu1 %v751_v0 }
 0x113   :  { %624 = vmatpush3.msra.mxu1 %v344_v58 }
 0x114   :  { %625 = vmatprep.subr.mxu1 %v751_v0 }
 0x115   :  { %626 = vmatpush3.msra.mxu1 %v343_v59 }
 0x116   :  { %627 = vmatprep.subr.mxu1 %v751_v0 }
 0x117   :  { %628 = vmatpush3.msra.mxu1 %v342_v60 }
 0x118   :  { %629 = vmatprep.subr.mxu1 %v751_v0 }
 0x119   :  { %630 = vmatpush3.msra.mxu1 %v341_v61 }
 0x11a   :  { %631 = vmatprep.subr.mxu1 %v751_v0 }
 0x11b   :  { %632 = vmatpush3.msra.mxu1 %v340_v62 }
 0x11c   :  { %633 = vmatprep.subr.mxu1 %v751_v0 }
 0x11d   :  { %634 = vmatpush3.msra.mxu1 %v339_v63 }
 0x11e   :  { %635 = vmatprep.subr.mxu1 %v751_v0 }
 0x11f   :  { %636 = vmatpush3.msra.mxu1 %v338_v1 }
 0x120   :  { %637 = vmatprep.subr.mxu1 %v751_v0 }
 0x121   :  { %638 = vmatpush3.msra.mxu1 %v337_v2 }
 0x122   :  { %639 = vmatprep.subr.mxu1 %v751_v0 }
 0x123   :  { %640 = vmatpush3.msra.mxu1 %v336_v3 }
 0x124   :  { %641 = vmatprep.subr.mxu1 %v751_v0 }
 0x125   :  { %642 = vmatpush3.msra.mxu1 %v335_v4 }
 0x126   :  { %643 = vmatprep.subr.mxu1 %v751_v0 }
 0x127   :  { %644 = vmatpush3.msra.mxu1 %v334_v10 }
 0x128   :  { %645 = vmatprep.subr.mxu1 %v751_v0 }
 0x129   :  { %646 = vmatpush3.msra.mxu1 %v333_v11 }
 0x12a   :  { %647 = vmatprep.subr.mxu1 %v751_v0 }
 0x12b   :  { %648 = vmatpush3.msra.mxu1 %v332_v12 }
 0x1cc   :  { %v233_v6 = vpop.f32.mrf.mxu1 }
 0x1cd   :  { %v234_v7 = vadd.f32 %v441_v5, %v233_v6 }
 0x1ce   :  { %v581_v8 = vpop.f32.mrf.mxu1 }
 0x1cf   :  { %v237_v9 = vmax.f32 %v234_v7, 0.0 }
 0x1d1   :  { %615 = vmatmul.mubr.f32.vlgmr.msra.gmra.mxu0 %v237_v9 }
 0x291   :  { %v326_v14 = vpop.f32.mrf.mxu0 }
 0x292   :  { %v327_v15 = vadd.f32 %v442_v13, %v326_v14 }
 0x293   :  { %v616_v16 = vpop.f32.mrf.mxu0 }
 0x294   :  { %v330_v17 = vmax.f32 %v327_v15, 0.0 }
 0x296   :  { %650 = vmatmul.mubr.f32.vlgmr.msra.gmra.mxu1 %v330_v17 }
 0x356   :  { %v419_v19 = vpop.f32.mrf.mxu1 }
 0x357   :  { %v420_v20 = vadd.f32 %v443_v18, %v419_v19 }
 0x358   :  { %v651_v21 = vpop.f32.mrf.mxu1 }
 0x359   :  { %423 = vst [vmem:[#allocation8] sm:$0xff] %v420_v20 }
 0x35a   :  { %731 = shalt.err (!%p728_p5)
}
 0x35b   :  { %433 = dma.vmem_to_hbm [thread:$0]  %s431_s2, 128, %s861_s3, [#allocation4]  }
 0x35c   :  { %744 = dma.done.wait [#allocation4], 128  }
 0x35d   :  { %745 = vsyncadd [#allocation4], 4294967168 }
 0x35e   :  { %437 = vsyncpa [#allocation3], 1 }
 0x35f   :  { %438 = vsyncpa [#allocation6], 1 }
 0x360   :  { %439 = vsyncpa [#allocation4], 1 }

</bundles_post_ra>
